<compile_context>
chip_gen: v7x
topology: tpu7x:2x2x1
jax: 0.10.0
libtpu: 0.0.40
codegen_flags: <defaults>
</compile_context>

<pallas_src>
import functools

import jax
import jax.numpy as jnp
from jax.experimental import pallas as pl
from jax.experimental.pallas import tpu as pltpu


def _round_up(x: int, m: int) -> int:
    return ((x + m - 1) // m) * m


def _fused_mlp_kernel(x_ref, *refs, n_layers: int, neg_slope: float):
    """Whole MLP on one batch tile.  refs = (w0, b0, w1, b1, ..., out_ref)."""
    out_ref = refs[-1]
    h = x_ref[...]                                    # (tm, K_pad) in VMEM
    for i in range(n_layers):                         # unrolled at trace time (5 layers)
        w = refs[2 * i][...]                          # (K_pad_i, N_pad_i)
        b = refs[2 * i + 1][...]                      # (1, N_pad_i)
        y = jnp.dot(h, w, preferred_element_type=jnp.float32)   # MXU
        y = y + b                                                # VPU broadcast add
        if i != n_layers - 1:
            y = jnp.maximum(y, neg_slope * y)                    # LeakyReLU(0.2)
        h = y
    out_ref[...] = h.astype(out_ref.dtype)


def prepare_padded_params(params):
    """Zero-pad all feature dims to multiples of 128 (done once per parameter set)."""
    in_dim = _round_up(params[0][0].shape[0], 128)
    padded = []
    for (w, b) in params:
        k, n = w.shape
        n_pad = _round_up(n, 128)
        w_p = jnp.zeros((in_dim, n_pad), w.dtype).at[:k, :n].set(w)
        b_p = jnp.zeros((1, n_pad), b.dtype).at[:, :n].set(b)
        padded.append((w_p, b_p))
        in_dim = n_pad
    return padded


def mapping_network_forward(x, params, *, neg_slope: float = 0.2, block_m: int = 512):
    """x: (M, K) f32; params: list of (W (in,out), b (1,out)) f32 -> (M, output_dim) f32."""
    M, K = x.shape
    n_layers = len(params)
    out_dim = params[-1][0].shape[1]

    padded = prepare_padded_params(params)
    K_pad = padded[0][0].shape[0]
    out_pad = padded[-1][0].shape[1]

    # Batch tiling: tm rows per grid step (multiple of 8 sublanes), weights full-resident.
    tm = min(_round_up(M, 8), block_m)
    M_pad = _round_up(M, tm)
    x_p = jnp.zeros((M_pad, K_pad), x.dtype).at[:M, :K].set(x)

    flat_inputs = [x_p]
    in_specs = [pl.BlockSpec((tm, K_pad), lambda i: (i, 0))]
    for (w_p, b_p) in padded:
        flat_inputs.extend([w_p, b_p])
        in_specs.append(pl.BlockSpec(w_p.shape, lambda i: (0, 0)))   # resident across grid
        in_specs.append(pl.BlockSpec(b_p.shape, lambda i: (0, 0)))

    kernel = functools.partial(_fused_mlp_kernel, n_layers=n_layers, neg_slope=neg_slope)
    out_p = pl.pallas_call(
        kernel,
        out_shape=jax.ShapeDtypeStruct((M_pad, out_pad), x.dtype),
        grid=(M_pad // tm,),
        in_specs=in_specs,
        out_specs=pl.BlockSpec((tm, out_pad), lambda i: (i, 0)),
        compiler_params=pltpu.CompilerParams(
            dimension_semantics=("parallel",),
        ),
    )(*flat_inputs)

    # TODO(synk): optionally cast activations/weights to bf16 (f32 accumulate) once the
    # batch is large enough for the matmuls to dominate; kept f32 to match the reference.
    return out_p[:M, :out_dim]


def init_mapping_network_params(key,
                                latent_dim: int,
                                hidden_dim: int,
                                output_dim: int,
                                n_hidden_layers: int):
    """Deterministic init mirroring nn.Linear's uniform(-1/sqrt(fan_in), 1/sqrt(fan_in))."""
    dims = [(latent_dim, hidden_dim)]
    dims += [(hidden_dim, hidden_dim)] * n_hidden_layers
    dims += [(hidden_dim, output_dim)]  # final output layer (no activation)
    params = []
    for (fan_in, fan_out) in dims:
        key, kw, kb = jax.random.split(key, 3)
        bound = 1.0 / jnp.sqrt(float(fan_in))
        # stored as (in, out) so the kernel computes x @ W directly
        w = jax.random.uniform(kw, (fan_in, fan_out), jnp.float32, -bound, bound)
        b = jax.random.uniform(kb, (1, fan_out), jnp.float32, -bound, bound)
        params.append((w, b))
    return params


def _reference_forward(x, params):
    out = x
    n_layers = len(params)
    for i, (w, b) in enumerate(params):
        y = out @ w + b
        if i != n_layers - 1:
            y = jnp.where(y > 0, y, 0.2 * y)
        out = y
    return out


if __name__ == "__main__":
    # Small shapes consistent with the module (latent -> hidden x(1+3) -> output).
    latent_dim = 64
    hidden_dim = 96
    output_dim = 96
    n_hidden_layers = 3

    key = jax.random.PRNGKey(0)
    key, kx1, kx2 = jax.random.split(key, 3)
    params = init_mapping_network_params(
        key, latent_dim, hidden_dim, output_dim, n_hidden_layers
    )

    fwd = jax.jit(lambda xx: mapping_network_forward(xx, params))

    # Case 1: tiny batch (single grid step).
    x1 = jax.random.normal(kx1, (8, latent_dim), jnp.float32)
    out1 = jax.block_until_ready(fwd(x1))
    ref1 = _reference_forward(x1, params)
    assert out1.shape == (8, output_dim)
    assert jnp.allclose(out1, ref1, atol=1e-4, rtol=1e-4), "mismatch vs reference (batch=8)"

    # Case 2: batch not a multiple of 8 (exercises the padding path).
    x2 = jax.random.normal(kx2, (13, latent_dim), jnp.float32)
    out2 = jax.block_until_ready(fwd(x2))
    ref2 = _reference_forward(x2, params)
    assert out2.shape == (13, output_dim)
    assert jnp.allclose(out2, ref2, atol=1e-4, rtol=1e-4), "mismatch vs reference (batch=13)"

    print("KERNEL_OK")
</pallas_src>

<mosaic_0001>
module attributes {stable_mosaic.version = 11 : i64} {
  func.func @_fused_mlp_kernel(%arg0: i32, %arg1: memref<8x128xf32, #tpu.memory_space<vmem>>, %arg2: memref<128x128xf32, #tpu.memory_space<vmem>>, %arg3: memref<1x128xf32, #tpu.memory_space<vmem>>, %arg4: memref<128x128xf32, #tpu.memory_space<vmem>>, %arg5: memref<1x128xf32, #tpu.memory_space<vmem>>, %arg6: memref<128x128xf32, #tpu.memory_space<vmem>>, %arg7: memref<1x128xf32, #tpu.memory_space<vmem>>, %arg8: memref<128x128xf32, #tpu.memory_space<vmem>>, %arg9: memref<1x128xf32, #tpu.memory_space<vmem>>, %arg10: memref<128x128xf32, #tpu.memory_space<vmem>>, %arg11: memref<1x128xf32, #tpu.memory_space<vmem>>, %arg12: memref<8x128xf32, #tpu.memory_space<vmem>>) attributes {dimension_semantics = [#tpu.dimension_semantics<parallel>], iteration_bounds = array<i64: 1>, scalar_prefetch = 0 : i64, scratch_operands = 0 : i64, tpu.core_type = #tpu.core_type<tc>, window_params = [{transform_indices = @transform_0, window_bounds = array<i64: 8, 128>}, {pipeline_mode = #tpu.pipeline_mode<synchronous>, transform_indices = @transform_1, window_bounds = array<i64: 128, 128>}, {pipeline_mode = #tpu.pipeline_mode<synchronous>, transform_indices = @transform_2, window_bounds = array<i64: 1, 128>}, {pipeline_mode = #tpu.pipeline_mode<synchronous>, transform_indices = @transform_3, window_bounds = array<i64: 128, 128>}, {pipeline_mode = #tpu.pipeline_mode<synchronous>, transform_indices = @transform_4, window_bounds = array<i64: 1, 128>}, {pipeline_mode = #tpu.pipeline_mode<synchronous>, transform_indices = @transform_5, window_bounds = array<i64: 128, 128>}, {pipeline_mode = #tpu.pipeline_mode<synchronous>, transform_indices = @transform_6, window_bounds = array<i64: 1, 128>}, {pipeline_mode = #tpu.pipeline_mode<synchronous>, transform_indices = @transform_7, window_bounds = array<i64: 128, 128>}, {pipeline_mode = #tpu.pipeline_mode<synchronous>, transform_indices = @transform_8, window_bounds = array<i64: 1, 128>}, {pipeline_mode = #tpu.pipeline_mode<synchronous>, transform_indices = @transform_9, window_bounds = array<i64: 128, 128>}, {pipeline_mode = #tpu.pipeline_mode<synchronous>, transform_indices = @transform_10, window_bounds = array<i64: 1, 128>}, {transform_indices = @transform_11, window_bounds = array<i64: 8, 128>}]} {
    %c0 = arith.constant 0 : index
    %c0_0 = arith.constant 0 : index
    %0 = vector.load %arg1[%c0, %c0_0] : memref<8x128xf32, #tpu.memory_space<vmem>>, vector<8x128xf32>
    %c0_1 = arith.constant 0 : index
    %c0_2 = arith.constant 0 : index
    %1 = vector.load %arg2[%c0_1, %c0_2] : memref<128x128xf32, #tpu.memory_space<vmem>>, vector<128x128xf32>
    %c0_3 = arith.constant 0 : index
    %c0_4 = arith.constant 0 : index
    %2 = vector.load %arg3[%c0_3, %c0_4] : memref<1x128xf32, #tpu.memory_space<vmem>>, vector<1x128xf32>
    %cst = arith.constant dense<0.000000e+00> : vector<8x128xf32>
    %3 = tpu.matmul %0, %1, %cst {dimension_numbers = #tpu.dot_dimension_numbers<[1], [0], [0], [1], [0, 0, 1, 1], [], []>} : vector<8x128xf32>, vector<128x128xf32>, vector<8x128xf32> -> vector<8x128xf32>
    %4 = vector.broadcast %2 : vector<1x128xf32> to vector<8x128xf32>
    %5 = arith.addf %3, %4 : vector<8x128xf32>
    %cst_5 = arith.constant 2.000000e-01 : f32
    %6 = vector.broadcast %cst_5 : f32 to vector<8x128xf32>
    %7 = arith.mulf %6, %5 : vector<8x128xf32>
    %8 = arith.maximumf %5, %7 : vector<8x128xf32>
    %c0_6 = arith.constant 0 : index
    %c0_7 = arith.constant 0 : index
    %9 = vector.load %arg4[%c0_6, %c0_7] : memref<128x128xf32, #tpu.memory_space<vmem>>, vector<128x128xf32>
    %c0_8 = arith.constant 0 : index
    %c0_9 = arith.constant 0 : index
    %10 = vector.load %arg5[%c0_8, %c0_9] : memref<1x128xf32, #tpu.memory_space<vmem>>, vector<1x128xf32>
    %cst_10 = arith.constant dense<0.000000e+00> : vector<8x128xf32>
    %11 = tpu.matmul %8, %9, %cst_10 {dimension_numbers = #tpu.dot_dimension_numbers<[1], [0], [0], [1], [0, 0, 1, 1], [], []>} : vector<8x128xf32>, vector<128x128xf32>, vector<8x128xf32> -> vector<8x128xf32>
    %12 = vector.broadcast %10 : vector<1x128xf32> to vector<8x128xf32>
    %13 = arith.addf %11, %12 : vector<8x128xf32>
    %cst_11 = arith.constant 2.000000e-01 : f32
    %14 = vector.broadcast %cst_11 : f32 to vector<8x128xf32>
    %15 = arith.mulf %14, %13 : vector<8x128xf32>
    %16 = arith.maximumf %13, %15 : vector<8x128xf32>
    %c0_12 = arith.constant 0 : index
    %c0_13 = arith.constant 0 : index
    %17 = vector.load %arg6[%c0_12, %c0_13] : memref<128x128xf32, #tpu.memory_space<vmem>>, vector<128x128xf32>
    %c0_14 = arith.constant 0 : index
    %c0_15 = arith.constant 0 : index
    %18 = vector.load %arg7[%c0_14, %c0_15] : memref<1x128xf32, #tpu.memory_space<vmem>>, vector<1x128xf32>
    %cst_16 = arith.constant dense<0.000000e+00> : vector<8x128xf32>
    %19 = tpu.matmul %16, %17, %cst_16 {dimension_numbers = #tpu.dot_dimension_numbers<[1], [0], [0], [1], [0, 0, 1, 1], [], []>} : vector<8x128xf32>, vector<128x128xf32>, vector<8x128xf32> -> vector<8x128xf32>
    %20 = vector.broadcast %18 : vector<1x128xf32> to vector<8x128xf32>
    %21 = arith.addf %19, %20 : vector<8x128xf32>
    %cst_17 = arith.constant 2.000000e-01 : f32
    %22 = vector.broadcast %cst_17 : f32 to vector<8x128xf32>
    %23 = arith.mulf %22, %21 : vector<8x128xf32>
    %24 = arith.maximumf %21, %23 : vector<8x128xf32>
    %c0_18 = arith.constant 0 : index
    %c0_19 = arith.constant 0 : index
    %25 = vector.load %arg8[%c0_18, %c0_19] : memref<128x128xf32, #tpu.memory_space<vmem>>, vector<128x128xf32>
    %c0_20 = arith.constant 0 : index
    %c0_21 = arith.constant 0 : index
    %26 = vector.load %arg9[%c0_20, %c0_21] : memref<1x128xf32, #tpu.memory_space<vmem>>, vector<1x128xf32>
    %cst_22 = arith.constant dense<0.000000e+00> : vector<8x128xf32>
    %27 = tpu.matmul %24, %25, %cst_22 {dimension_numbers = #tpu.dot_dimension_numbers<[1], [0], [0], [1], [0, 0, 1, 1], [], []>} : vector<8x128xf32>, vector<128x128xf32>, vector<8x128xf32> -> vector<8x128xf32>
    %28 = vector.broadcast %26 : vector<1x128xf32> to vector<8x128xf32>
    %29 = arith.addf %27, %28 : vector<8x128xf32>
    %cst_23 = arith.constant 2.000000e-01 : f32
    %30 = vector.broadcast %cst_23 : f32 to vector<8x128xf32>
    %31 = arith.mulf %30, %29 : vector<8x128xf32>
    %32 = arith.maximumf %29, %31 : vector<8x128xf32>
    %c0_24 = arith.constant 0 : index
    %c0_25 = arith.constant 0 : index
    %33 = vector.load %arg10[%c0_24, %c0_25] : memref<128x128xf32, #tpu.memory_space<vmem>>, vector<128x128xf32>
    %c0_26 = arith.constant 0 : index
    %c0_27 = arith.constant 0 : index
    %34 = vector.load %arg11[%c0_26, %c0_27] : memref<1x128xf32, #tpu.memory_space<vmem>>, vector<1x128xf32>
    %cst_28 = arith.constant dense<0.000000e+00> : vector<8x128xf32>
    %35 = tpu.matmul %32, %33, %cst_28 {dimension_numbers = #tpu.dot_dimension_numbers<[1], [0], [0], [1], [0, 0, 1, 1], [], []>} : vector<8x128xf32>, vector<128x128xf32>, vector<8x128xf32> -> vector<8x128xf32>
    %36 = vector.broadcast %34 : vector<1x128xf32> to vector<8x128xf32>
    %37 = arith.addf %35, %36 : vector<8x128xf32>
    %c0_29 = arith.constant 0 : index
    %c0_30 = arith.constant 0 : index
    %38 = vector.load %arg12[%c0_29, %c0_30] : memref<8x128xf32, #tpu.memory_space<vmem>>, vector<8x128xf32>
    tpu.vector_store %arg12[%c0_29, %c0_30], %37 {strides = array<i32>} : memref<8x128xf32, #tpu.memory_space<vmem>>, vector<8x128xf32>,
    return
  }
  func.func @transform_0(%arg0: i32) -> (i32, i32) {
    %c0_i32 = arith.constant 0 : i32
    %c0_i32_0 = arith.constant 0 : i32
    return %arg0, %c0_i32 : i32, i32
  }
  func.func @transform_1(%arg0: i32) -> (i32, i32) {
    %c0_i32 = arith.constant 0 : i32
    %c0_i32_0 = arith.constant 0 : i32
    %c0_i32_1 = arith.constant 0 : i32
    return %c0_i32, %c0_i32_0 : i32, i32
  }
  func.func @transform_2(%arg0: i32) -> (i32, i32) {
    %c0_i32 = arith.constant 0 : i32
    %c0_i32_0 = arith.constant 0 : i32
    %c0_i32_1 = arith.constant 0 : i32
    return %c0_i32, %c0_i32_0 : i32, i32
  }
  func.func @transform_3(%arg0: i32) -> (i32, i32) {
    %c0_i32 = arith.constant 0 : i32
    %c0_i32_0 = arith.constant 0 : i32
    %c0_i32_1 = arith.constant 0 : i32
    return %c0_i32, %c0_i32_0 : i32, i32
  }
  func.func @transform_4(%arg0: i32) -> (i32, i32) {
    %c0_i32 = arith.constant 0 : i32
    %c0_i32_0 = arith.constant 0 : i32
    %c0_i32_1 = arith.constant 0 : i32
    return %c0_i32, %c0_i32_0 : i32, i32
  }
  func.func @transform_5(%arg0: i32) -> (i32, i32) {
    %c0_i32 = arith.constant 0 : i32
    %c0_i32_0 = arith.constant 0 : i32
    %c0_i32_1 = arith.constant 0 : i32
    return %c0_i32, %c0_i32_0 : i32, i32
  }
  func.func @transform_6(%arg0: i32) -> (i32, i32) {
    %c0_i32 = arith.constant 0 : i32
    %c0_i32_0 = arith.constant 0 : i32
    %c0_i32_1 = arith.constant 0 : i32
    return %c0_i32, %c0_i32_0 : i32, i32
  }
  func.func @transform_7(%arg0: i32) -> (i32, i32) {
    %c0_i32 = arith.constant 0 : i32
    %c0_i32_0 = arith.constant 0 : i32
    %c0_i32_1 = arith.constant 0 : i32
    return %c0_i32, %c0_i32_0 : i32, i32
  }
  func.func @transform_8(%arg0: i32) -> (i32, i32) {
    %c0_i32 = arith.constant 0 : i32
    %c0_i32_0 = arith.constant 0 : i32
    %c0_i32_1 = arith.constant 0 : i32
    return %c0_i32, %c0_i32_0 : i32, i32
  }
  func.func @transform_9(%arg0: i32) -> (i32, i32) {
    %c0_i32 = arith.constant 0 : i32
    %c0_i32_0 = arith.constant 0 : i32
    %c0_i32_1 = arith.constant 0 : i32
    return %c0_i32, %c0_i32_0 : i32, i32
  }
  func.func @transform_10(%arg0: i32) -> (i32, i32) {
    %c0_i32 = arith.constant 0 : i32
    %c0_i32_0 = arith.constant 0 : i32
    %c0_i32_1 = arith.constant 0 : i32
    return %c0_i32, %c0_i32_0 : i32, i32
  }
  func.func @transform_11(%arg0: i32) -> (i32, i32) {
    %c0_i32 = arith.constant 0 : i32
    %c0_i32_0 = arith.constant 0 : i32
    return %arg0, %c0_i32 : i32, i32
  }
}

</mosaic_0001>

<bundles_post_ra>
// kernel: _lambda_.1
= control target key start
LH: loop header
LB: loop body
LE: loop exit
PB: predicated region body
PF: predicated region fallthrough
CT: control target
= control target key end

     0   :  { %16 = vsyncpa [#allocation3], 0  ;;  %s1375_s0 = inlined_call_operand.vmem [shape: f32[8,128], index: 0, kind: input, shape index: {}]   ;;  %s1376_s1 = inlined_call_operand.hbm [shape: f32[128,128], index: 1, kind: input, shape index: {}]   ;;  %s1377_s2 = inlined_call_operand.vmem [shape: f32[1,128], index: 2, kind: input, shape index: {}]   ;;  %s1378_s3 = inlined_call_operand.hbm [shape: f32[128,128], index: 3, kind: input, shape index: {}]   ;;  %s1379_s4 = inlined_call_operand.vmem [shape: f32[1,128], index: 4, kind: input, shape index: {}]   ;;  %s1380_s5 = inlined_call_operand.hbm [shape: f32[128,128], index: 5, kind: input, shape index: {}]   ;;  %s1381_s6 = inlined_call_operand.vmem [shape: f32[1,128], index: 6, kind: input, shape index: {}]   ;;  %s1382_s7 = inlined_call_operand.hbm [shape: f32[128,128], index: 7, kind: input, shape index: {}]   ;;  %s1383_s8 = inlined_call_operand.vmem [shape: f32[1,128], index: 8, kind: input, shape index: {}]   ;;  %s1384_s9 = inlined_call_operand.hbm [shape: f32[128,128], index: 9, kind: input, shape index: {}]   ;;  %s1385_s10 = inlined_call_operand.vmem [shape: f32[1,128], index: 10, kind: input, shape index: {}]   ;;  %s1386_s11 = inlined_call_operand.hbm [shape: f32[8,128], index: 11, kind: output, shape index: {}]  }
   0x1   :  { %17 = vsyncpa [#allocation6], 0 }
   0x2   :  { %18 = vsyncpa [#allocation9], 0 }
   0x3   :  { %19 = vsyncpa [#allocation4], 0  ;;  %s1135_s17 = smov [#allocation5]   ;;  %s1136_s19 = smov [#allocation8]  }
   0x4   :  { %s41_s18 = sshll.u32 %s1135_s17, 4  ;;  %s69_s20 = sshll.u32 %s1136_s19, 4  ;;  %s42_s18 = int_to_ptr.vmem [resolvable:$true] %s41_s18  ;;  %s1206_s20 = int_to_ptr.vmem [resolvable:$true] %s69_s20 }
   0x5   :  { %s995_s23 = scalar_lea.hbm %s1378_s3, 2048 }
   0x6   :  { %p996_p0 = scmp.ne.s32.totalorder %s1378_s3, %s995_s23  ;;  %p999_p1 = scmp.lt.u32.totalorder %s995_s23, %s1378_s3 }
   0x8   :  { %p1001_p2 = pnand %p999_p1, %p996_p0 }
   0xa   :  { %1004 = shalt.err (!%p1001_p2)
}
   0xb   :  { %s1005_s28 = scalar_lea.vmem %s42_s18, 2048  ;;  %p1010_p4 = scmp.lt.s32.totalorder %s42_s18, %s42_s18 }
   0xc   :  { %p1006_p3 = scmp.ne.s32.totalorder %s42_s18, %s1005_s28  ;;  %p1011_p5 = scmp.lt.s32.totalorder %s1005_s28, %s1005_s28 }
   0xe   :  { %p1012_p6 = por %p1011_p5, %p1010_p4 }
  0x10   :  { %p1013_p7 = pnand %p1012_p6, %p1006_p3 }
  0x12   :  { %1016 = shalt.err (!%p1013_p7)
}
  0x13   :  { %s1137_s29 = smov 128   ;;  %s1138_s30 = smov 8  }
  0x14   :  { %47 = dma.hbm_to_vmem [thread:$0]  %s1378_s3, 2048, %s42_s18, [#allocation6], %s1137_s29, %s1137_s29, %s1138_s30  }
  0x15   :  { %s1017_s16 = scalar_lea.hbm %s1382_s7, 2048 }
  0x16   :  { %p1018_p8 = scmp.ne.s32.totalorder %s1382_s7, %s1017_s16  ;;  %p1021_p9 = scmp.lt.u32.totalorder %s1017_s16, %s1382_s7 }
  0x18   :  { %p1023_p10 = pnand %p1021_p9, %p1018_p8 }
  0x1a   :  { %1026 = shalt.err (!%p1023_p10)
}
  0x1b   :  { %s1027_s23 = scalar_lea.vmem %s1206_s20, 2048  ;;  %p1032_p12 = scmp.lt.s32.totalorder %s1206_s20, %s1206_s20 }
  0x1c   :  { %p1028_p11 = scmp.ne.s32.totalorder %s1206_s20, %s1027_s23  ;;  %p1033_p13 = scmp.lt.s32.totalorder %s1027_s23, %s1027_s23 }
  0x1e   :  { %p1034_p0 = por %p1033_p13, %p1032_p12 }
  0x20   :  { %p1035_p1 = pnand %p1034_p0, %p1028_p11 }
  0x22   :  { %1038 = shalt.err (!%p1035_p1)
}
  0x23   :  { %75 = dma.hbm_to_vmem [thread:$0]  %s1382_s7, 2048, %s1206_s20, [#allocation9], %s1137_s29, %s1137_s29, %s1138_s30  }
  0x24   :  { %s1139_s24 = smov [#allocation2]   ;;  %s1140_s26 = smov [#allocation7]  }
  0x25   :  { %s27_s25 = sshll.u32 %s1139_s24, 4  ;;  %s55_s27 = sshll.u32 %s1140_s26, 4  ;;  %s28_s25 = int_to_ptr.vmem [resolvable:$true] %s27_s25  ;;  %s1243_s27 = int_to_ptr.vmem [resolvable:$true] %s55_s27 }
  0x26   :  { %s1039_s13 = scalar_lea.hbm %s1376_s1, 2048 }
  0x27   :  { %p1040_p2 = scmp.ne.s32.totalorder %s1376_s1, %s1039_s13  ;;  %p1043_p3 = scmp.lt.u32.totalorder %s1039_s13, %s1376_s1 }
  0x29   :  { %p1045_p4 = pnand %p1043_p3, %p1040_p2 }
  0x2b   :  { %1048 = shalt.err (!%p1045_p4)
}
  0x2c   :  { %s1049_s7 = scalar_lea.vmem %s28_s25, 2048  ;;  %p1054_p6 = scmp.lt.s32.totalorder %s28_s25, %s28_s25 }
  0x2d   :  { %p1050_p5 = scmp.ne.s32.totalorder %s28_s25, %s1049_s7  ;;  %p1055_p7 = scmp.lt.s32.totalorder %s1049_s7, %s1049_s7 }
  0x2f   :  { %p1056_p8 = por %p1055_p7, %p1054_p6 }
  0x31   :  { %p1057_p9 = pnand %p1056_p8, %p1050_p5 }
  0x33   :  { %1060 = shalt.err (!%p1057_p9)
}
  0x34   :  { %33 = dma.hbm_to_vmem [thread:$0]  %s1376_s1, 2048, %s28_s25, [#allocation3], %s1137_s29, %s1137_s29, %s1138_s30  }
  0x35   :  { %s1061_s23 = scalar_lea.hbm %s1380_s5, 2048 }
  0x36   :  { %p1062_p10 = scmp.ne.s32.totalorder %s1380_s5, %s1061_s23  ;;  %p1065_p11 = scmp.lt.u32.totalorder %s1061_s23, %s1380_s5 }
  0x38   :  { %p1067_p12 = pnand %p1065_p11, %p1062_p10 }
  0x3a   :  { %1070 = shalt.err (!%p1067_p12)
}
  0x3b   :  { %s1071_s28 = scalar_lea.vmem %s1243_s27, 2048  ;;  %p1076_p0 = scmp.lt.s32.totalorder %s1243_s27, %s1243_s27 }
  0x3c   :  { %p1072_p13 = scmp.ne.s32.totalorder %s1243_s27, %s1071_s28  ;;  %p1077_p1 = scmp.lt.s32.totalorder %s1071_s28, %s1071_s28 }
  0x3e   :  { %p1078_p2 = por %p1077_p1, %p1076_p0 }
  0x40   :  { %p1079_p3 = pnand %p1078_p2, %p1072_p13 }
  0x42   :  { %1082 = shalt.err (!%p1079_p3)
}
  0x43   :  { %61 = dma.hbm_to_vmem [thread:$0]  %s1380_s5, 2048, %s1243_s27, [#allocation6], %s1137_s29, %s1137_s29, %s1138_s30  }
  0x44   :  { %s1141_s12 = smov [#allocation10]   ;;  %s1083_s16 = scalar_lea.hbm %s1384_s9, 2048 }
  0x45   :  { %s83_s13 = sshll.u32 %s1141_s12, 4  ;;  %p1084_p4 = scmp.ne.s32.totalorder %s1384_s9, %s1083_s16  ;;  %s84_s13 = int_to_ptr.vmem [resolvable:$true] %s83_s13 }
  0x46   :  { %p1087_p5 = scmp.lt.u32.totalorder %s1083_s16, %s1384_s9 }
  0x48   :  { %p1089_p6 = pnand %p1087_p5, %p1084_p4 }
  0x4a   :  { %1092 = shalt.err (!%p1089_p6)
}
  0x4b   :  { %s1093_s21 = scalar_lea.vmem %s84_s13, 2048  ;;  %p1098_p8 = scmp.lt.s32.totalorder %s84_s13, %s84_s13 }
  0x4c   :  { %p1094_p7 = scmp.ne.s32.totalorder %s84_s13, %s1093_s21  ;;  %p1099_p9 = scmp.lt.s32.totalorder %s1093_s21, %s1093_s21 }
  0x4e   :  { %p1100_p10 = por %p1099_p9, %p1098_p8 }
  0x50   :  { %p1101_p11 = pnand %p1100_p10, %p1094_p7 }
  0x52   :  { %1104 = shalt.err (!%p1101_p11)
}
  0x53   :  { %89 = dma.hbm_to_vmem [thread:$0]  %s1384_s9, 2048, %s84_s13, [#allocation9], %s1137_s29, %s1137_s29, %s1138_s30  }
  0x54   :  { %1127 = dma.done.wait [#allocation3], 2048  }
  0x55   :  { %1128 = vsyncadd [#allocation3], 4294965248 }
  0x56   :  { %1129 = dma.done.wait [#allocation6], 4096  }
  0x57   :  { %1130 = vsyncadd [#allocation6], 4294963200 }
  0x58   :  { %1131 = dma.done.wait [#allocation9], 4096  }
  0x59   :  { %1132 = vsyncadd [#allocation9], 4294963200  ;;  %v1142_v0 = vmov 0.0|0.0   ;;  %vm1143_vm0 = vmmov 0   ;;  %v1144_v1 = vmov 0.0   ;;  %v108_v2 = vld [vmem:[#allocation2] sm:$0xff] }
  0x5a   :  { %864 = vmatprep.subr.bf16.mxu0 %v1142_v0  ;;  %721 = vmatprep.mubr.msk.f32.mxu0 %vm1143_vm0, %v1144_v1  ;;  %v109_v3 = vld [vmem:[#allocation2 + $0x8] sm:$0xff]  ;;  %v110_v4 = vld [vmem:[#allocation2 + $0x10] sm:$0xff]  ;;  %v111_v6 = vld [vmem:[#allocation2 + $0x18] sm:$0xff]  ;;  %s1145_s26 = smov [#allocation11]  }
  0x5b   :  { %888 = vmatprep.subr.bf16.mxu1 %v1142_v0  ;;  %756 = vmatprep.mubr.msk.f32.mxu1 %vm1143_vm0, %v1144_v1  ;;  %v865_v5 = vpack.c.bf16 %v109_v3, %v108_v2  ;;  %v868_v7 = vpack.c.bf16 %v111_v6, %v110_v4  ;;  %v112_v8 = vld [vmem:[#allocation2 + $0x20] sm:$0xff]  ;;  %v113_v9 = vld [vmem:[#allocation2 + $0x28] sm:$0xff]  ;;  %v205_v12 = vld [vmem:[#allocation5 + $0x10] sm:$0xff]  ;;  %s588_s28 = sshll.u32 %s1145_s26, 4  ;;  %s589_s28 = int_to_ptr.vmem [resolvable:$true] %s588_s28 }
  0x5c   :  { %v203_v10 = vld [vmem:[#allocation5] sm:$0xff]  ;;  %v204_v11 = vld [vmem:[#allocation5 + $0x8] sm:$0xff]  ;;  %v206_v13 = vld [vmem:[#allocation5 + $0x18] sm:$0xff]  ;;  %v871_v14 = vpack.c.bf16 %v113_v9, %v112_v8  ;;  %s1105_s1 = scalar_lea.vmem %s589_s28, 128  ;;  %p1110_p13 = scmp.lt.s32.totalorder %s589_s28, %s589_s28 }
  0x5d   :  { %866 = vmatpush3.bf16.msra.mxu0 %v865_v5  ;;  %v889_v15 = vpack.c.bf16 %v204_v11, %v203_v10  ;;  %v114_v16 = vld [vmem:[#allocation2 + $0x30] sm:$0xff]  ;;  %v115_v17 = vld [vmem:[#allocation2 + $0x38] sm:$0xff]  ;;  %v892_v18 = vpack.c.bf16 %v206_v13, %v205_v12  ;;  %v207_v19 = vld [vmem:[#allocation5 + $0x20] sm:$0xff]  ;;  %p1106_p12 = scmp.ne.s32.totalorder %s589_s28, %s1105_s1  ;;  %p1111_p0 = scmp.lt.s32.totalorder %s1105_s1, %s1105_s1 }
  0x5e   :  { %867 = vmatprep.subr.bf16.mxu0 %v1142_v0  ;;  %v208_v20 = vld [vmem:[#allocation5 + $0x28] sm:$0xff]  ;;  %v874_v21 = vpack.c.bf16 %v115_v17, %v114_v16  ;;  %v116_v22 = vld [vmem:[#allocation2 + $0x40] sm:$0xff]  ;;  %v209_v25 = vld [vmem:[#allocation5 + $0x30] sm:$0xff] }
  0x5f   :  { %890 = vmatpush3.bf16.msra.mxu1 %v889_v15  ;;  %v117_v23 = vld [vmem:[#allocation2 + $0x48] sm:$0xff]  ;;  %v895_v24 = vpack.c.bf16 %v208_v20, %v207_v19  ;;  %v210_v26 = vld [vmem:[#allocation5 + $0x38] sm:$0xff]  ;;  %v118_v28 = vld [vmem:[#allocation2 + $0x50] sm:$0xff]  ;;  %p1112_p1 = por %p1111_p0, %p1110_p13 }
  0x60   :  { %891 = vmatprep.subr.bf16.mxu1 %v1142_v0  ;;  %v877_v27 = vpack.c.bf16 %v117_v23, %v116_v22  ;;  %v119_v29 = vld [vmem:[#allocation2 + $0x58] sm:$0xff]  ;;  %v898_v30 = vpack.c.bf16 %v210_v26, %v209_v25  ;;  %v211_v31 = vld [vmem:[#allocation5 + $0x40] sm:$0xff]  ;;  %v212_v32 = vld [vmem:[#allocation5 + $0x48] sm:$0xff] }
  0x61   :  { %869 = vmatpush3.bf16.msra.mxu0 %v868_v7  ;;  %v880_v33 = vpack.c.bf16 %v119_v29, %v118_v28  ;;  %v120_v34 = vld [vmem:[#allocation2 + $0x60] sm:$0xff]  ;;  %v121_v35 = vld [vmem:[#allocation2 + $0x68] sm:$0xff]  ;;  %v901_v36 = vpack.c.bf16 %v212_v32, %v211_v31  ;;  %v213_v37 = vld [vmem:[#allocation5 + $0x50] sm:$0xff]  ;;  %p1113_p2 = pnand %p1112_p1, %p1106_p12 }
  0x62   :  { %870 = vmatprep.subr.bf16.mxu0 %v1142_v0  ;;  %v214_v38 = vld [vmem:[#allocation5 + $0x58] sm:$0xff]  ;;  %v883_v39 = vpack.c.bf16 %v121_v35, %v120_v34  ;;  %v122_v40 = vld [vmem:[#allocation2 + $0x70] sm:$0xff]  ;;  %v107_v44 = vld [vmem:[%s1375_s0] sm:$0xff] }
  0x63   :  { %893 = vmatpush3.bf16.msra.mxu1 %v892_v18  ;;  %v123_v41 = vld [vmem:[#allocation2 + $0x78] sm:$0xff]  ;;  %v904_v42 = vpack.c.bf16 %v214_v38, %v213_v37  ;;  %v215_v45 = vld [vmem:[#allocation5 + $0x60] sm:$0xff]  ;;  %v216_v46 = vld [vmem:[#allocation5 + $0x68] sm:$0xff] }
  0x64   :  { %894 = vmatprep.subr.bf16.mxu1 %v1142_v0  ;;  %v886_v43 = vpack.c.bf16 %v123_v41, %v122_v40  ;;  %v907_v47 = vpack.c.bf16 %v216_v46, %v215_v45  ;;  %v217_v48 = vld [vmem:[#allocation5 + $0x70] sm:$0xff]  ;;  %v218_v49 = vld [vmem:[#allocation5 + $0x78] sm:$0xff]  ;;  %v298_v51 = vld [vmem:[#allocation7] sm:$0xff] }
  0x65   :  { %872 = vmatpush3.bf16.msra.mxu0 %v871_v14  ;;  %v910_v50 = vpack.c.bf16 %v218_v49, %v217_v48  ;;  %v299_v52 = vld [vmem:[#allocation7 + $0x8] sm:$0xff]  ;;  %v300_v53 = vld [vmem:[#allocation7 + $0x10] sm:$0xff]  ;;  %v301_v55 = vld [vmem:[#allocation7 + $0x18] sm:$0xff] }
  0x66   :  { %873 = vmatprep.subr.bf16.mxu0 %v1142_v0  ;;  %v913_v54 = vpack.c.bf16 %v299_v52, %v298_v51  ;;  %v916_v56 = vpack.c.bf16 %v301_v55, %v300_v53  ;;  %v302_v57 = vld [vmem:[#allocation7 + $0x20] sm:$0xff]  ;;  %v303_v58 = vld [vmem:[#allocation7 + $0x28] sm:$0xff]  ;;  %v304_v60 = vld [vmem:[#allocation7 + $0x30] sm:$0xff] }
  0x67   :  { %896 = vmatpush3.bf16.msra.mxu1 %v895_v24  ;;  %v919_v59 = vpack.c.bf16 %v303_v58, %v302_v57  ;;  %v305_v61 = vld [vmem:[#allocation7 + $0x38] sm:$0xff]  ;;  %v306_v63 = vld [vmem:[#allocation7 + $0x40] sm:$0xff]  ;;  %v307_v2 = vld [vmem:[#allocation7 + $0x48] sm:$0xff] }
  0x68   :  { %897 = vmatprep.subr.bf16.mxu1 %v1142_v0  ;;  %v922_v62 = vpack.c.bf16 %v305_v61, %v304_v60  ;;  %v925_v3 = vpack.c.bf16 %v307_v2, %v306_v63  ;;  %v308_v4 = vld [vmem:[#allocation7 + $0x50] sm:$0xff]  ;;  %v309_v5 = vld [vmem:[#allocation7 + $0x58] sm:$0xff]  ;;  %v599_v7 = vld [vmem:[%s1377_s2] ss:$0 sm:$0xff] }
  0x69   :  { %875 = vmatpush3.bf16.msra.mxu0 %v874_v21  ;;  %v928_v6 = vpack.c.bf16 %v309_v5, %v308_v4  ;;  %v310_v13 = vld [vmem:[#allocation7 + $0x60] sm:$0xff]  ;;  %v311_v14 = vld [vmem:[#allocation7 + $0x68] sm:$0xff]  ;;  %v312_v16 = vld [vmem:[#allocation7 + $0x70] sm:$0xff] }
  0x6a   :  { %876 = vmatprep.subr.bf16.mxu0 %v1142_v0  ;;  %v931_v15 = vpack.c.bf16 %v311_v14, %v310_v13  ;;  %v313_v17 = vld [vmem:[#allocation7 + $0x78] sm:$0xff]  ;;  %v393_v19 = vld [vmem:[#allocation8] sm:$0xff]  ;;  %v394_v20 = vld [vmem:[#allocation8 + $0x8] sm:$0xff] }
  0x6b   :  { %899 = vmatpush3.bf16.msra.mxu1 %v898_v30  ;;  %v934_v18 = vpack.c.bf16 %v313_v17, %v312_v16  ;;  %v395_v21 = vld [vmem:[#allocation8 + $0x10] sm:$0xff]  ;;  %v937_v22 = vpack.c.bf16 %v394_v20, %v393_v19  ;;  %v396_v23 = vld [vmem:[#allocation8 + $0x18] sm:$0xff]  ;;  %v397_v25 = vld [vmem:[#allocation8 + $0x20] sm:$0xff] }
  0x6c   :  { %900 = vmatprep.subr.bf16.mxu1 %v1142_v0  ;;  %v940_v24 = vpack.c.bf16 %v396_v23, %v395_v21  ;;  %v398_v26 = vld [vmem:[#allocation8 + $0x28] sm:$0xff]  ;;  %v399_v28 = vld [vmem:[#allocation8 + $0x30] sm:$0xff]  ;;  %v400_v29 = vld [vmem:[#allocation8 + $0x38] sm:$0xff] }
  0x6d   :  { %878 = vmatpush3.bf16.msra.mxu0 %v877_v27  ;;  %v943_v27 = vpack.c.bf16 %v398_v26, %v397_v25  ;;  %v946_v30 = vpack.c.bf16 %v400_v29, %v399_v28  ;;  %v401_v31 = vld [vmem:[#allocation8 + $0x40] sm:$0xff]  ;;  %v402_v32 = vld [vmem:[#allocation8 + $0x48] sm:$0xff]  ;;  %v403_v34 = vld [vmem:[#allocation8 + $0x50] sm:$0xff] }
  0x6e   :  { %879 = vmatprep.subr.bf16.mxu0 %v1142_v0  ;;  %v404_v35 = vld [vmem:[#allocation8 + $0x58] sm:$0xff]  ;;  %v600_v37 = vld [vmem:[%s1379_s4] ss:$0 sm:$0xff]  ;;  %v407_v46 = vld [vmem:[#allocation8 + $0x70] sm:$0xff] }
  0x6f   :  { %902 = vmatpush3.bf16.msra.mxu1 %v901_v36  ;;  %v952_v36 = vpack.c.bf16 %v404_v35, %v403_v34  ;;  %v488_v49 = vld [vmem:[#allocation10] sm:$0xff]  ;;  %v490_v51 = vld [vmem:[#allocation10 + $0x10] sm:$0xff]  ;;  %v491_v53 = vld [vmem:[#allocation10 + $0x18] sm:$0xff] }
  0x70   :  { %903 = vmatprep.subr.bf16.mxu1 %v1142_v0  ;;  %v493_v55 = vld [vmem:[#allocation10 + $0x28] sm:$0xff]  ;;  %v494_v57 = vld [vmem:[#allocation10 + $0x30] sm:$0xff]  ;;  %v495_v58 = vld [vmem:[#allocation10 + $0x38] sm:$0xff] }
  0x71   :  { %881 = vmatpush3.bf16.msra.mxu0 %v880_v33  ;;  %v949_v33 = vpack.c.bf16 %v402_v32, %v401_v31  ;;  %v496_v60 = vld [vmem:[#allocation10 + $0x40] sm:$0xff]  ;;  %v497_v61 = vld [vmem:[#allocation10 + $0x48] sm:$0xff]  ;;  %v498_v63 = vld [vmem:[#allocation10 + $0x50] sm:$0xff] }
  0x72   :  { %882 = vmatprep.subr.bf16.mxu0 %v1142_v0  ;;  %v499_v2 = vld [vmem:[#allocation10 + $0x58] sm:$0xff]  ;;  %v601_v4 = vld [vmem:[%s1381_s6] ss:$0 sm:$0xff]  ;;  %v502_v13 = vld [vmem:[#allocation10 + $0x70] sm:$0xff] }
  0x73   :  { %905 = vmatpush3.bf16.msra.mxu1 %v904_v42  ;;  %v503_v14 = vld [vmem:[#allocation10 + $0x78] sm:$0xff]  ;;  %v602_v16 = vld [vmem:[%s1383_s8] ss:$0 sm:$0xff] }
  0x74   :  { %906 = vmatprep.subr.bf16.mxu1 %v1142_v0 }
  0x75   :  { %884 = vmatpush3.bf16.msra.mxu0 %v883_v39 }
  0x76   :  { %885 = vmatprep.subr.bf16.mxu0 %v1142_v0 }
  0x77   :  { %908 = vmatpush3.bf16.msra.mxu1 %v907_v47  ;;  %v408_v47 = vld [vmem:[#allocation8 + $0x78] sm:$0xff] }
  0x78   :  { %909 = vmatprep.subr.bf16.mxu1 %v1142_v0  ;;  %v958_v48 = vpack.c.bf16 %v408_v47, %v407_v46 }
  0x79   :  { %887 = vmatpush3.bf16.msra.mxu0 %v886_v43  ;;  %v405_v43 = vld [vmem:[#allocation8 + $0x60] sm:$0xff] }
  0x7a   :  { %912 = vmatprep.subr.bf16.mxu0 %v1142_v0 }
  0x7b   :  { %911 = vmatpush3.bf16.msra.mxu1 %v910_v50  ;;  %v489_v50 = vld [vmem:[#allocation10 + $0x8] sm:$0xff] }
  0x7c   :  { %722 = vmatmul.mubr.f32.vlgmr.msra.gmra.mrb[0].mxu0 %v107_v44  ;;  %936 = vmatprep.subr.bf16.mxu1 %v1142_v0  ;;  %v406_v44 = vld [vmem:[#allocation8 + $0x68] sm:$0xff]  ;;  %v961_v52 = vpack.c.bf16 %v489_v50, %v488_v49 }
  0x7d   :  { %791 = vmatprep.mubr.msk.f32.mxu0 %vm1143_vm0, %v1144_v1  ;;  %914 = vmatpush3.bf16.msra.mxu0 %v913_v54  ;;  %v955_v45 = vpack.c.bf16 %v406_v44, %v405_v43  ;;  %v964_v54 = vpack.c.bf16 %v491_v53, %v490_v51 }
  0x7e   :  { %915 = vmatprep.subr.bf16.mxu0 %v1142_v0 }
  0x81   :  { %917 = vmatpush3.bf16.msra.mxu0 %v916_v56 }
  0x82   :  { %918 = vmatprep.subr.bf16.mxu0 %v1142_v0 }
  0x85   :  { %920 = vmatpush3.bf16.msra.mxu0 %v919_v59  ;;  %v970_v59 = vpack.c.bf16 %v495_v58, %v494_v57 }
  0x86   :  { %921 = vmatprep.subr.bf16.mxu0 %v1142_v0 }
  0x89   :  { %923 = vmatpush3.bf16.msra.mxu0 %v922_v62  ;;  %v973_v62 = vpack.c.bf16 %v497_v61, %v496_v60 }
  0x8a   :  { %924 = vmatprep.subr.bf16.mxu0 %v1142_v0 }
  0x8d   :  { %926 = vmatpush3.bf16.msra.mxu0 %v925_v3  ;;  %v976_v3 = vpack.c.bf16 %v499_v2, %v498_v63 }
  0x8e   :  { %927 = vmatprep.subr.bf16.mxu0 %v1142_v0 }
  0x91   :  { %929 = vmatpush3.bf16.msra.mxu0 %v928_v6 }
  0x92   :  { %930 = vmatprep.subr.bf16.mxu0 %v1142_v0 }
  0x95   :  { %932 = vmatpush3.bf16.msra.mxu0 %v931_v15  ;;  %v982_v15 = vpack.c.bf16 %v503_v14, %v502_v13 }
  0x96   :  { %933 = vmatprep.subr.bf16.mxu0 %v1142_v0 }
  0x99   :  { %935 = vmatpush3.bf16.msra.mxu0 %v934_v18 }
  0x9a   :  { %960 = vmatprep.subr.bf16.mxu0 %v1142_v0 }
 0x14f   :  { %v197_v8 = vpop.f32.mrb[0].mxu0 }
 0x150   :  { %v198_v9 = vadd.f32 %v599_v7, %v197_v8  ;;  %v723_v10 = vpop.f32.mrb[1].mxu0 }
 0x151   :  { %v500_v10 = vld [vmem:[#allocation10 + $0x60] sm:$0xff] }
 0x152   :  { %v201_v11 = vmul.f32 0.2, %v198_v9 }
 0x154   :  { %v202_v12 = vmax.f32 %v198_v9, %v201_v11  ;;  %v501_v11 = vld [vmem:[#allocation10 + $0x68] sm:$0xff] }
 0x156   :  { %757 = vmatmul.mubr.f32.vlgmr.msra.gmra.mrb[0].mxu1 %v202_v12  ;;  %v979_v12 = vpack.c.bf16 %v501_v11, %v500_v10 }
 0x157   :  { %826 = vmatprep.mubr.msk.f32.mxu1 %vm1143_vm0, %v1144_v1  ;;  %938 = vmatpush3.bf16.msra.mxu1 %v937_v22  ;;  %v603_v22 = vld [vmem:[%s1385_s10] ss:$0 sm:$0xff] }
 0x158   :  { %939 = vmatprep.subr.bf16.mxu1 %v1142_v0 }
 0x15b   :  { %941 = vmatpush3.bf16.msra.mxu1 %v940_v24 }
 0x15c   :  { %942 = vmatprep.subr.bf16.mxu1 %v1142_v0 }
 0x15f   :  { %944 = vmatpush3.bf16.msra.mxu1 %v943_v27 }
 0x160   :  { %945 = vmatprep.subr.bf16.mxu1 %v1142_v0 }
 0x163   :  { %947 = vmatpush3.bf16.msra.mxu1 %v946_v30 }
 0x164   :  { %948 = vmatprep.subr.bf16.mxu1 %v1142_v0 }
 0x167   :  { %950 = vmatpush3.bf16.msra.mxu1 %v949_v33 }
 0x168   :  { %951 = vmatprep.subr.bf16.mxu1 %v1142_v0 }
 0x16b   :  { %953 = vmatpush3.bf16.msra.mxu1 %v952_v36 }
 0x16c   :  { %954 = vmatprep.subr.bf16.mxu1 %v1142_v0 }
 0x16f   :  { %956 = vmatpush3.bf16.msra.mxu1 %v955_v45 }
 0x170   :  { %957 = vmatprep.subr.bf16.mxu1 %v1142_v0 }
 0x173   :  { %959 = vmatpush3.bf16.msra.mxu1 %v958_v48 }
 0x229   :  { %v292_v38 = vpop.f32.mrb[0].mxu1 }
 0x22a   :  { %v293_v39 = vadd.f32 %v600_v37, %v292_v38  ;;  %v758_v40 = vpop.f32.mrb[1].mxu1 }
 0x22c   :  { %v296_v41 = vmul.f32 0.2, %v293_v39 }
 0x22e   :  { %v297_v42 = vmax.f32 %v293_v39, %v296_v41 }
 0x230   :  { %792 = vmatmul.mubr.f32.vlgmr.msra.gmra.mrb[2].mxu0 %v297_v42 }
 0x231   :  { %861 = vmatprep.mubr.msk.f32.mxu0 %vm1143_vm0, %v1144_v1  ;;  %962 = vmatpush3.bf16.msra.mxu0 %v961_v52  ;;  %v492_v1 = vld [vmem:[#allocation10 + $0x20] sm:$0xff] }
 0x232   :  { %963 = vmatprep.subr.bf16.mxu0 %v1142_v0  ;;  %v967_v56 = vpack.c.bf16 %v493_v55, %v492_v1 }
 0x235   :  { %965 = vmatpush3.bf16.msra.mxu0 %v964_v54 }
 0x236   :  { %966 = vmatprep.subr.bf16.mxu0 %v1142_v0 }
 0x239   :  { %968 = vmatpush3.bf16.msra.mxu0 %v967_v56 }
 0x23a   :  { %969 = vmatprep.subr.bf16.mxu0 %v1142_v0 }
 0x23d   :  { %971 = vmatpush3.bf16.msra.mxu0 %v970_v59 }
 0x23e   :  { %972 = vmatprep.subr.bf16.mxu0 %v1142_v0 }
 0x241   :  { %974 = vmatpush3.bf16.msra.mxu0 %v973_v62 }
 0x242   :  { %975 = vmatprep.subr.bf16.mxu0 %v1142_v0 }
 0x245   :  { %977 = vmatpush3.bf16.msra.mxu0 %v976_v3 }
 0x246   :  { %978 = vmatprep.subr.bf16.mxu0 %v1142_v0 }
 0x249   :  { %980 = vmatpush3.bf16.msra.mxu0 %v979_v12 }
 0x24a   :  { %981 = vmatprep.subr.bf16.mxu0 %v1142_v0 }
 0x24d   :  { %983 = vmatpush3.bf16.msra.mxu0 %v982_v15 }
 0x303   :  { %v387_v5 = vpop.f32.mrb[2].mxu0 }
 0x304   :  { %v388_v6 = vadd.f32 %v601_v4, %v387_v5  ;;  %v793_v7 = vpop.f32.mrb[3].mxu0 }
 0x306   :  { %v391_v8 = vmul.f32 0.2, %v388_v6 }
 0x308   :  { %v392_v9 = vmax.f32 %v388_v6, %v391_v8 }
 0x30a   :  { %827 = vmatmul.mubr.f32.vlgmr.msra.gmra.mrb[2].mxu1 %v392_v9 }
 0x3dd   :  { %v482_v17 = vpop.f32.mrb[2].mxu1 }
 0x3de   :  { %v483_v18 = vadd.f32 %v602_v16, %v482_v17  ;;  %v828_v19 = vpop.f32.mrb[3].mxu1 }
 0x3e0   :  { %v486_v20 = vmul.f32 0.2, %v483_v18 }
 0x3e2   :  { %v487_v21 = vmax.f32 %v483_v18, %v486_v20 }
 0x3e4   :  { %862 = vmatmul.mubr.f32.vlgmr.msra.gmra.mrb[4].mxu0 %v487_v21 }
 0x4b7   :  { %v577_v0 = vpop.f32.mrb[4].mxu0 }
 0x4b8   :  { %v578_v23 = vadd.f32 %v603_v22, %v577_v0  ;;  %v863_v24 = vpop.f32.mrb[5].mxu0 }
 0x4ba   :  { %581 = vst [vmem:[#allocation11] sm:$0xff] %v578_v23 }
 0x4bb   :  { %1116 = shalt.err (!%p1113_p2)
}
 0x4bc   :  { %s1117_s12 = scalar_lea.hbm %s1386_s11, 128 }
 0x4bd   :  { %p1118_p3 = scmp.ne.s32.totalorder %s1386_s11, %s1117_s12  ;;  %p1121_p4 = scmp.lt.u32.totalorder %s1117_s12, %s1386_s11 }
 0x4bf   :  { %p1123_p5 = pnand %p1121_p4, %p1118_p3 }
 0x4c1   :  { %1126 = shalt.err (!%p1123_p5)
}
 0x4c2   :  { %591 = dma.vmem_to_hbm [thread:$0]  %s589_s28, 128, %s1386_s11, [#allocation4]  }
 0x4c3   :  { %1133 = dma.done.wait [#allocation4], 128  }
 0x4c4   :  { %1134 = vsyncadd [#allocation4], 4294967168 }
 0x4c5   :  { %595 = vsyncpa [#allocation3], 1 }
 0x4c6   :  { %596 = vsyncpa [#allocation6], 1 }
 0x4c7   :  { %597 = vsyncpa [#allocation9], 1 }
 0x4c8   :  { %598 = vsyncpa [#allocation4], 1 }

</bundles_post_ra>
